<compile_context>
chip_gen: v7x
topology: tpu7x:2x2x1
jax: 0.10.0
libtpu: 0.0.40
codegen_flags: <defaults>
</compile_context>

<pallas_src>
import functools

import jax
import jax.numpy as jnp
from jax import lax
from jax.experimental import pallas as pl
from jax.experimental.pallas import tpu as pltpu


def _ce_kernel(x_ref, y_ref, out_ref, *, needs_mask):
    """x_ref: (1, C, TL) logits; y_ref: (1, 1, TL) int32 labels;
    out_ref: (1, 1, TL) f32 per-lane partial NLL sums (resident accumulator)."""
    j = pl.program_id(1)

    @pl.when(j == 0)
    def _():
        out_ref[...] = jnp.zeros_like(out_ref)

    logits = x_ref[0].astype(jnp.float32)        # (C, TL)  f32 compute
    labels = y_ref[0]                            # (1, TL)  int32

    # numerically stable log-sum-exp over the class (sublane) axis
    m = jnp.max(logits, axis=0, keepdims=True)                               # (1, TL)
    lse = m + jnp.log(jnp.sum(jnp.exp(logits - m), axis=0, keepdims=True))   # (1, TL)

    # gather logit[label] via a sublane one-hot compare (VPU select, no MXU,
    # no dynamic gather)
    cls = lax.broadcasted_iota(jnp.int32, logits.shape, 0)                   # (C, TL)
    picked = jnp.sum(jnp.where(cls == labels, logits, 0.0),
                     axis=0, keepdims=True)                                  # (1, TL)

    nll = lse - picked                                                       # (1, TL)
    if needs_mask:
        # mask lane-padding (labels < 0) -- only emitted when padding exists
        nll = jnp.where(labels >= 0, nll, 0.0)

    # accumulate per-lane partial sums (pure VPU) into the resident output block
    out_ref[...] += nll[None]


def ce_loss(x, y, *, target_lanes=131072):
    """x: (N, C, H, W) float logits (NCHW, like PyTorch); y: (N, H, W) int labels.
    Returns mean cross-entropy over all N*H*W positions (reduction='mean')."""
    N, C, H, W = x.shape
    HW = H * W
    M = N * HW

    logits = x.reshape(N, C, HW)                     # no transpose, pure reshape
    labels = y.reshape(N, 1, HW).astype(jnp.int32)   # lane-dense label layout

    # pad spatial axis to a multiple of 128 lanes; padded lanes get label -1
    pad = (-HW) % 128
    if pad:
        logits = jnp.pad(logits, ((0, 0), (0, 0), (0, pad)))
        labels = jnp.pad(labels, ((0, 0), (0, 0), (0, pad)), constant_values=-1)
    HWp = HW + pad

    # lane-block size: largest multiple of 128 that divides HWp, capped at target
    tl = min(HWp, target_lanes)
    tl -= tl % 128
    while HWp % tl:
        tl -= 128
    n_inner = HWp // tl

    kernel = functools.partial(_ce_kernel, needs_mask=bool(pad))

    partials = pl.pallas_call(
        kernel,
        out_shape=jax.ShapeDtypeStruct((N, 1, tl), jnp.float32),
        grid_spec=pltpu.PrefetchScalarGridSpec(
            num_scalar_prefetch=0,
            grid=(N, n_inner),
            in_specs=[
                pl.BlockSpec((1, C, tl), lambda n, j: (n, 0, j)),   # logits block
                pl.BlockSpec((1, 1, tl), lambda n, j: (n, 0, j)),   # labels block
            ],
            out_specs=pl.BlockSpec((1, 1, tl), lambda n, j: (n, 0, 0)),
        ),
        compiler_params=pltpu.CompilerParams(
            dimension_semantics=("parallel", "arbitrary"),
        ),
    )(logits, labels)

    # single tiny cross-lane reduction outside the kernel
    return jnp.sum(partials) / jnp.float32(M)


def _reference(x, y):
    # plain-JAX reference of nn.CrossEntropyLoss(reduction='mean')
    C = x.shape[1]
    logits = jnp.transpose(x, (0, 2, 3, 1)).reshape(-1, C).astype(jnp.float32)
    labels = y.reshape(-1)
    logp = jax.nn.log_softmax(logits, axis=-1)
    nll = -jnp.take_along_axis(logp, labels[:, None], axis=-1)[:, 0]
    return jnp.mean(nll)


if __name__ == "__main__":
    key = jax.random.PRNGKey(0)

    # Case 1: clean shapes (HW multiple of 128), single inner step per batch
    kx, ky, key = jax.random.split(key, 3)
    N, C, H, W = 2, 5, 16, 16                     # module hard-codes 5 classes
    x = jax.random.normal(kx, (N, C, H, W), dtype=jnp.float32)
    y = jax.random.randint(ky, (N, H, W), 0, C, dtype=jnp.int32)
    loss = jax.block_until_ready(ce_loss(x, y))
    ref = jax.block_until_ready(_reference(x, y))
    assert jnp.allclose(loss, ref, rtol=1e-5, atol=1e-5), (loss, ref)

    # Case 2: force small lane blocks -> exercises the multi-step accumulator path
    loss2 = jax.block_until_ready(ce_loss(x, y, target_lanes=128))
    assert jnp.allclose(loss2, ref, rtol=1e-5, atol=1e-5), (loss2, ref)

    # Case 3: HW not a multiple of 128 -> exercises lane padding + mask path
    kx, ky, key = jax.random.split(key, 3)
    N3, H3, W3 = 2, 10, 10                        # HW = 100 -> padded to 128
    x3 = jax.random.normal(kx, (N3, C, H3, W3), dtype=jnp.float32)
    y3 = jax.random.randint(ky, (N3, H3, W3), 0, C, dtype=jnp.int32)
    loss3 = jax.block_until_ready(ce_loss(x3, y3))
    ref3 = jax.block_until_ready(_reference(x3, y3))
    assert jnp.allclose(loss3, ref3, rtol=1e-5, atol=1e-5), (loss3, ref3)

    # Case 4: bf16 logits accepted at the HBM boundary (f32 math inside kernel)
    loss4 = jax.block_until_ready(ce_loss(x.astype(jnp.bfloat16), y))
    ref4 = jax.block_until_ready(_reference(x.astype(jnp.bfloat16), y))
    assert jnp.allclose(loss4, ref4, rtol=2e-2, atol=2e-2), (loss4, ref4)

    print("KERNEL_OK")
</pallas_src>

<mosaic_0001>
module attributes {stable_mosaic.version = 11 : i64} {
  func.func @_ce_kernel(%arg0: i32, %arg1: i32, %arg2: memref<1x5x256xf32, #tpu.memory_space<vmem>>, %arg3: memref<1x1x256xi32, #tpu.memory_space<vmem>>, %arg4: memref<1x1x256xf32, #tpu.memory_space<vmem>>) attributes {dimension_semantics = [#tpu.dimension_semantics<parallel>, #tpu.dimension_semantics<arbitrary>], iteration_bounds = array<i64: 2, 1>, scalar_prefetch = 0 : i64, scratch_operands = 0 : i64, tpu.core_type = #tpu.core_type<tc>, window_params = [{transform_indices = @transform_0, window_bounds = array<i64: 1, 5, 256>}, {transform_indices = @transform_1, window_bounds = array<i64: 1, 1, 256>}, {transform_indices = @transform_2, window_bounds = array<i64: 1, 1, 256>}]} {
    %c0_i32 = arith.constant 0 : i32
    %0 = arith.cmpi eq, %arg1, %c0_i32 : i32
    %1 = arith.extui %0 : i1 to i32
    %c0_i32_0 = arith.constant 0 : i32
    %2 = arith.cmpi ne, %1, %c0_i32_0 : i32
    scf.if %2 {
      %cst_15 = arith.constant 0.000000e+00 : f32
      %28 = vector.broadcast %cst_15 : f32 to vector<1x1x256xf32>
      %c0_16 = arith.constant 0 : index
      %c0_17 = arith.constant 0 : index
      %c0_18 = arith.constant 0 : index
      %29 = vector.load %arg4[%c0_16, %c0_17, %c0_18] : memref<1x1x256xf32, #tpu.memory_space<vmem>>, vector<1x1x256xf32>
      tpu.vector_store %arg4[%c0_16, %c0_17, %c0_18], %28 {strides = array<i32>} : memref<1x1x256xf32, #tpu.memory_space<vmem>>, vector<1x1x256xf32>,
    } else {
    }
    %c0 = arith.constant 0 : index
    %c0_1 = arith.constant 0 : index
    %c0_2 = arith.constant 0 : index
    %3 = vector.load %arg2[%c0, %c0_1, %c0_2] : memref<1x5x256xf32, #tpu.memory_space<vmem>>, vector<1x5x256xf32>
    %4 = vector.shape_cast %3 : vector<1x5x256xf32> to vector<5x256xf32>
    %c0_3 = arith.constant 0 : index
    %c0_4 = arith.constant 0 : index
    %c0_5 = arith.constant 0 : index
    %5 = vector.load %arg3[%c0_3, %c0_4, %c0_5] : memref<1x1x256xi32, #tpu.memory_space<vmem>>, vector<1x1x256xi32>
    %6 = vector.shape_cast %5 : vector<1x1x256xi32> to vector<1x256xi32>
    %cst = arith.constant dense<0xFF800000> : vector<256xf32>
    %7 = vector.multi_reduction <maximumf>, %4, %cst [0] : vector<5x256xf32> to vector<256xf32>
    %8 = vector.shape_cast %7 : vector<256xf32> to vector<1x256xf32>
    %9 = vector.broadcast %8 : vector<1x256xf32> to vector<5x256xf32>
    %10 = arith.subf %4, %9 : vector<5x256xf32>
    %11 = math.exp %10 : vector<5x256xf32>
    %cst_6 = arith.constant dense<0.000000e+00> : vector<256xf32>
    %12 = vector.multi_reduction <add>, %11, %cst_6 [0] : vector<5x256xf32> to vector<256xf32>
    %13 = vector.shape_cast %12 : vector<256xf32> to vector<1x256xf32>
    %14 = math.log %13 : vector<1x256xf32>
    %15 = arith.addf %8, %14 : vector<1x256xf32>
    %16 = tpu.iota {dimensions = array<i32: 0>} : vector<5x256xi32>
    %17 = vector.broadcast %6 : vector<1x256xi32> to vector<5x256xi32>
    %18 = arith.cmpi eq, %16, %17 : vector<5x256xi32>
    %cst_7 = arith.constant 0.000000e+00 : f32
    %19 = vector.broadcast %cst_7 : f32 to vector<5x256xf32>
    %20 = arith.select %18, %4, %19 : vector<5x256xi1>, vector<5x256xf32>
    %cst_8 = arith.constant dense<0.000000e+00> : vector<256xf32>
    %21 = vector.multi_reduction <add>, %20, %cst_8 [0] : vector<5x256xf32> to vector<256xf32>
    %22 = vector.shape_cast %21 : vector<256xf32> to vector<1x256xf32>
    %23 = arith.subf %15, %22 : vector<1x256xf32>
    %c0_9 = arith.constant 0 : index
    %c0_10 = arith.constant 0 : index
    %c0_11 = arith.constant 0 : index
    %24 = vector.load %arg4[%c0_9, %c0_10, %c0_11] : memref<1x1x256xf32, #tpu.memory_space<vmem>>, vector<1x1x256xf32>
    %25 = vector.shape_cast %23 : vector<1x256xf32> to vector<1x1x256xf32>
    %26 = arith.addf %24, %25 : vector<1x1x256xf32>
    %c0_12 = arith.constant 0 : index
    %c0_13 = arith.constant 0 : index
    %c0_14 = arith.constant 0 : index
    %27 = vector.load %arg4[%c0_12, %c0_13, %c0_14] : memref<1x1x256xf32, #tpu.memory_space<vmem>>, vector<1x1x256xf32>
    tpu.vector_store %arg4[%c0_12, %c0_13, %c0_14], %26 {strides = array<i32>} : memref<1x1x256xf32, #tpu.memory_space<vmem>>, vector<1x1x256xf32>,
    return
  }
  func.func @transform_0(%arg0: i32, %arg1: i32) -> (i32, i32, i32) {
    %c0_i32 = arith.constant 0 : i32
    %c0_i32_0 = arith.constant 0 : i32
    return %arg0, %c0_i32, %arg1 : i32, i32, i32
  }
  func.func @transform_1(%arg0: i32, %arg1: i32) -> (i32, i32, i32) {
    %c0_i32 = arith.constant 0 : i32
    %c0_i32_0 = arith.constant 0 : i32
    return %arg0, %c0_i32, %arg1 : i32, i32, i32
  }
  func.func @transform_2(%arg0: i32, %arg1: i32) -> (i32, i32, i32) {
    %c0_i32 = arith.constant 0 : i32
    %c0_i32_0 = arith.constant 0 : i32
    %c0_i32_1 = arith.constant 0 : i32
    return %arg0, %c0_i32, %c0_i32_0 : i32, i32, i32
  }
}

</mosaic_0001>

<bundles_post_ra>
// kernel: tpu_custom_call.1
= control target key start
LH: loop header
LB: loop body
LE: loop exit
PB: predicated region body
PF: predicated region fallthrough
CT: control target
= control target key end

     0   :  { %7 = vsyncpa [#allocation3], 0  ;;  %s732_s0 = inlined_call_operand.vmem [shape: f32[2,5,256], index: 0, kind: input, shape index: {}]   ;;  %s733_s1 = inlined_call_operand.vmem [shape: s32[2,1,256], index: 1, kind: input, shape index: {}]   ;;  %s734_s2 = inlined_call_operand.hbm [shape: f32[2,1,256], index: 2, kind: output, shape index: {}]  }
   0x1   :  { %9 = vsyncpa [#allocation3 + $0x1], 0  ;;  %s593_s9 = smov 0   ;;  %s595_s10 = smov 0  }
   0x2   :  { %s597_s11 = smov 0   ;;  %s599_s12 = smov 0  }
   0x3   :  { %s601_s13 = smov 0   ;;  %s603_s14 = smov 0  }
   0x4 LB: > { %s414_s15 = sadd.s32 4294967295, %s573_s14   ;;  %s415_s16 = sadd.s32 4294967294, %s573_s14   ;;  %s573_s14 = sphi %s603_s14, %s15_s14   ;;  %s569_s13 = sphi %s601_s13, %s743_s13   ;;  %s565_s12 = sphi %s599_s12, %s742_s12   ;;  %s561_s11 = sphi %s597_s11, %s741_s11   ;;  %s557_s10 = sphi %s595_s10, %s740_s10   ;;  %s553_s9 = sphi %s593_s9, %s739_s9  }
   0x5   : > { %s27_s17 = sadd.s32 1, %s569_s13  ;;  %s90_s18 = sadd.s32 1, %s561_s11 }
   0x6   : > { %p29_p0 = scmp.ge.s32.totalorder %s27_s17, 2  ;;  %p100_p1 = scmp.ne.s32.totalorder %s561_s11, %s557_s10 }
   0x7   : > { %p101_p2 = scmp.eq.s32.totalorder %s414_s15, 1  ;;  %p106_p3 = scmp.ne.s32.totalorder %s557_s10, %s553_s9 }
   0x8   : > { %s745_s17 = smov (%p29_p0, %s27_s17), 0  ;;  %p107_p5 = scmp.eq.s32.totalorder %s415_s16, 1 }
   0x9   : > { %p633_p4 = por %p101_p2, %p100_p1  ;;  %s87_s20 = ssub.s32 %s569_s13, %s745_s17 }
   0xa   : > { %p418_p6 = scmp.ge.s32.totalorder %s573_s14, 1  ;;  %p88_p7 = scmp.eq.s32.totalorder %s87_s20, 0 }
   0xb   : > { %p640_p8 = por %p107_p5, %p106_p3  ;;  %p150_p9 = scmp.lt.s32.totalorder %s573_s14, 3 }
   0xc   : > { %s646_s22 = scalar_select %p88_p7, %s561_s11, %s90_s18  }
   0xd   : > { %p151_p10 = pnand %p418_p6, %p150_p9 }
   0xe   : > { %s181_s23 = sand.u32 (!%p151_p10), 1, %s557_s10   ;;  %p185_p11 = scmp.lt.s32.totalorder (!%p151_p10), %s565_s12, 1  ;;  %v207_v0 = vlaneseq (!%p151_p10)  ;;  %v575_v2 = vmov (!%p151_p10), 0.0   ;;  %vm215_vm1 = vcmask (!%p151_p10), 1044480   ;;  %v576_v59 = vmov (!%p151_p10), 1966171168  }
   0xf   : > { %154 = sbr.rel (%p151_p10) target bundleno = 108 (0x6c), region = 28  ;;  %s419_s24 = sshll.u32 (!%p151_p10), %s181_s23, 1  ;;  %v291_v60 = vunpack.c.l.s4 (!%p151_p10), %v576_v59 }
  0x10   : > { %vm652_vm0 = vcmp.lt.s32.totalorder (!%p151_p10), %v207_v0, 256  ;;  %s657_s26 = scalar_lea.vmem (!%p151_p10), [#allocation2], %s419_s24  ;;  %v257_v17 = vshrl.u32 (!%p151_p10), %v207_v0, 7  ;;  %s429_s7 = sshll.u32 (!%p151_p10), %s565_s12, 5 }
  0x11   : > { %211 = vst.msk [vmem:[%s657_s26] sm:$0x3] (!%p151_p10), %vm652_vm0, %v575_v2  ;;  %s326_s8 = sshll.u32 (!%p151_p10), %s657_s26, 4  ;;  %s680_s18 = scalar_lea.hbm (!%p151_p10), %s734_s2, %s429_s7  ;;  %s682_s8 = int_to_ptr.vmem [resolvable:$true] %s326_s8 }
  0x12   : > { %v260_v22 = vsub.s32 (!%p151_p10), 0, %v257_v17  ;;  %v264_v26 = vsub.s32 (!%p151_p10), 1, %v257_v17  ;;  %s312_s20 = scalar_lea.sflag (!%p151_p10), [#allocation3], %s181_s23  ;;  %s495_s24 = scalar_lea.vmem (!%p151_p10), %s682_s8, 32 }
  0x13   : > { %p496_p12 = scmp.ne.s32.totalorder (!%p151_p10), %s682_s8, %s495_s24 }
  0x15   : > { %p497_p13 = pnand (!%p151_p10), %p496_p12, %p633_p4 }
  0x16   : > { %s186_s25 = scalar_select %p185_p11, %s565_s12, 1 }
  0x17   : > { %p498_p0 = pneg %p497_p13  ;;  %s577_s12 = smov [#allocation2]  }
  0x18   : > { %s428_s27 = sshll.u32 %s186_s25, 4  ;;  %s422_s3 = sshll.u32 %s186_s25, 1 }
  0x19   : > { %s192_s30 = scalar_lea.vmem %s732_s0, %s428_s27  ;;  %s201_s6 = scalar_lea.vmem %s733_s1, %s422_s3 }
  0x1a   : > { %v212_v3 = vld [vmem:[%s192_s30] sm:$0x1f]  ;;  %v213_v4 = vld [vmem:[%s192_s30 + $0x8] sm:$0x1f]  ;;  %s499_s25 = sshll.u32 %s577_s12, 4  ;;  %s500_s25 = int_to_ptr.vmem [resolvable:$false] %s499_s25 }
  0x1b   : > { %v216_v5 = vsel %vm215_vm1, %v212_v3, -inf  ;;  %v223_v6 = vsel %vm215_vm1, %v213_v4, -inf  ;;  %v214_v25 = vld [vmem:[%s201_s6] sm:$0x3]  ;;  %s501_s27 = scalar_lea.vmem %s500_s25, 64  ;;  %p502_p1 = scmp.lt.s32.totalorder %s682_s8, %s500_s25 }
  0x1c   : > { %v217_v7 = vrot.slane %v216_v5, 4  ;;  %v224_v8 = vrot.slane %v223_v6, 4  ;;  %v261_v27 = vrot.slane %v214_v25, %v260_v22  ;;  %v265_v28 = vrot.slane %v214_v25, %v264_v26  ;;  %p503_p2 = scmp.lt.s32.totalorder %s501_s27, %s495_s24 }
  0x1e   : > { %v218_v9 = vmax.f32 %v216_v5, %v217_v7  ;;  %v225_v10 = vmax.f32 %v223_v6, %v224_v8  ;;  %vm266_vm2 = vcmp.eq.s32.totalorder %v257_v17, %v261_v27  ;;  %vm267_vm3 = vcmp.eq.s32.totalorder %v257_v17, %v265_v28  ;;  %p504_p3 = por %p503_p2, %p502_p1 }
  0x1f   : > { %v268_v29 = vsel %vm266_vm2, %v212_v3, 0.0  ;;  %v269_v31 = vsel %vm267_vm3, %v213_v4, 0.0 }
  0x20   : > { %v219_v11 = vrot.slane %v218_v9, 2  ;;  %v226_v12 = vrot.slane %v225_v10, 2  ;;  %v270_v34 = vsel %vm215_vm1, %v268_v29, 0.0  ;;  %v277_v37 = vsel %vm215_vm1, %v269_v31, 0.0  ;;  %p505_p5 = pnand %p504_p3, %p498_p0 }
  0x21   : > { %v271_v40 = vrot.slane %v270_v34, 4  ;;  %v278_v42 = vrot.slane %v277_v37, 4 }
  0x22   : > { %v220_v13 = vmax.f32 %v218_v9, %v219_v11  ;;  %v227_v14 = vmax.f32 %v225_v10, %v226_v12  ;;  %v286_v12 = vld [vmem:[%s657_s26] sm:$0x3] }
  0x23   : > { %v272_v47 = vadd.f32 %v271_v40, %v270_v34  ;;  %v279_v49 = vadd.f32 %v278_v42, %v277_v37 }
  0x24   : > { %v221_v15 = vrot.slane %v220_v13, 1  ;;  %v228_v16 = vrot.slane %v227_v14, 1 }
  0x25   : > { %v273_v53 = vrot.slane %v272_v47, 2  ;;  %v280_v54 = vrot.slane %v279_v49, 2 }
  0x26   : > { %v222_v18 = vmax.f32 %v220_v13, %v221_v15  ;;  %v229_v19 = vmax.f32 %v227_v14, %v228_v16 }
  0x27   : > { %v274_v55 = vadd.f32 %v273_v53, %v272_v47  ;;  %v281_v56 = vadd.f32 %v280_v54, %v279_v49 }
  0x28   : > { %v230_v20 = vsub.f32 %v212_v3, %v222_v18  ;;  %v231_v21 = vsub.f32 %v213_v4, %v229_v19  ;;  %v292_v4 = vunpack.c.0.s8 %v291_v60 }
  0x29   : > { %v275_v57 = vrot.slane %v274_v55, 1  ;;  %v282_v58 = vrot.slane %v281_v56, 1 }
  0x2a   : > { %v232_v23 = vmul.f32 1.442695, %v230_v20  ;;  %v234_v24 = vmul.f32 1.442695, %v231_v21  ;;  %v295_v9 = vsub.s32 %v292_v4, %v257_v17 }
  0x2b   : > { %v276_v0 = vadd.f32 %v275_v57, %v274_v55  ;;  %v283_v3 = vadd.f32 %v282_v58, %v281_v56 }
  0x2c   : > { %487 = vpow2.f32 %v232_v23 }
  0x2d   : > { %489 = vpow2.f32 %v234_v24 }
  0x36   : > { %v488_v30 = vpop.eup %487 }
  0x37   : > { %v490_v32 = vpop.eup %489  ;;  %v236_v33 = vsel %vm215_vm1, %v488_v30, 0.0 }
  0x38   : > { %v237_v35 = vrot.slane %v236_v33, 4  ;;  %v243_v36 = vsel %vm215_vm1, %v490_v32, 0.0 }
  0x39   : > { %v244_v38 = vrot.slane %v243_v36, 4 }
  0x3a   : > { %v238_v39 = vadd.f32 %v237_v35, %v236_v33 }
  0x3b   : > { %v245_v41 = vadd.f32 %v244_v38, %v243_v36 }
  0x3c   : > { %v239_v43 = vrot.slane %v238_v39, 2 }
  0x3d   : > { %v246_v44 = vrot.slane %v245_v41, 2 }
  0x3e   : > { %v240_v45 = vadd.f32 %v239_v43, %v238_v39 }
  0x3f   : > { %v247_v46 = vadd.f32 %v246_v44, %v245_v41 }
  0x40   : > { %v241_v48 = vrot.slane %v240_v45, 1 }
  0x41   : > { %v248_v50 = vrot.slane %v247_v46, 1 }
  0x42   : > { %v242_v51 = vadd.f32 %v241_v48, %v240_v45 }
  0x43   : > { %v249_v52 = vadd.f32 %v248_v50, %v247_v46 }
  0x44   : > { %491 = vlog2.f32 %v242_v51 }
  0x45   : > { %493 = vlog2.f32 %v249_v52 }
  0x4e   : > { %v492_v61 = vpop.eup %491 }
  0x4f   : > { %v494_v62 = vpop.eup %493  ;;  %v251_v63 = vmul.f32 0.6931472, %v492_v61 }
  0x50   : > { %v253_v2 = vmul.f32 0.6931472, %v494_v62 }
  0x51   : > { %v254_v5 = vadd.f32 %v251_v63, %v222_v18 }
  0x52   : > { %v255_v6 = vadd.f32 %v253_v2, %v229_v19 }
  0x53   : > { %v284_v7 = vsub.f32 %v254_v5, %v276_v0 }
  0x54   : > { %v285_v8 = vsub.f32 %v255_v6, %v283_v3 }
  0x56   : > { %v289_v10 = vcombine.low %v284_v7, %v285_v8 }
  0x58   : > { %v296_v11 = vrot.slane %v289_v10, %v295_v9 }
  0x5a   : > { %v303_v13 = vrot.slane %v296_v11, %v295_v9 }
  0x5c   : > { %v305_v14 = vadd.f32 %v303_v13, %v286_v12 }
  0x5e   : > { %310 = vst.msk [vmem:[%s657_s26] sm:$0x3] %vm652_vm0, %v305_v14 }
  0x5f   : > { %508 = shalt.err (!%p505_p5)
}
  0x60   : > { %s509_s23 = scalar_lea.hbm %s680_s18, 32  ;;  %s513_s29 = scalar_lea.hbm %s734_s2, 64 }
  0x61   : > { %p510_p6 = scmp.ne.s32.totalorder %s680_s18, %s509_s23  ;;  %p514_p10 = scmp.lt.u32.totalorder %s680_s18, %s734_s2 }
  0x62   : > { %p515_p11 = scmp.lt.u32.totalorder %s513_s29, %s509_s23  ;;  %p517_p13 = scmp.lt.u32.totalorder %s509_s23, %s680_s18 }
  0x63   : > { %p511_p7 = pnand %p510_p6, %p633_p4 }
  0x64   : > { %p516_p12 = por %p515_p11, %p514_p10 }
  0x65   : > { %p512_p9 = pneg %p511_p7 }
  0x66   : > { %p518_p0 = por %p517_p13, %p516_p12 }
  0x68   : > { %p519_p1 = pnand %p518_p0, %p512_p9 }
  0x6a   : > { %522 = shalt.err (!%p519_p1)
}
  0x6b   : > { %430 = dma.vmem_to_hbm [thread:$0]  (%p633_p4), %s682_s8, 32, %s680_s18, %s312_s20  }
  0x6c PF: > { %p436_p2 = scmp.ge.s32.totalorder %s573_s14, 2  ;;  %s338_s4 = sand.u32 1, %s553_s9  }
  0x6d   : > { %s339_s5 = scalar_lea.sflag [#allocation3], %s338_s4 }
  0x6e   : > { %p433_p3 = pnand %p436_p2, %p640_p8 }
  0x70   : > { %548 = dma.done.wait (!%p433_p3), %s339_s5, 32  }
  0x71   : > { %550 = vsyncadd (!%p433_p3), %s339_s5, 4294967264  ;;  %s15_s14 = sadd.s32 1, %s573_s14   ;;  %s739_s9 = smov %s557_s10 }
  0x72   : > { %p12_p5 = scmp.ge.s32.totalorder %s15_s14, 4   ;;  %s740_s10 = smov %s561_s11 }
  0x73   : > { %s741_s11 = smov %s646_s22  ;;  %s742_s12 = smov %s569_s13 }
  0x74   : > { %s743_s13 = smov %s745_s17  ;;  %14 = sbr.rel (!%p12_p5) target bundleno = 4 (0x4), region = 70 }
  0x7b   :  { %344 = vsyncpa [#allocation3], 1 }
  0x7c   :  { %346 = vsyncpa [#allocation3 + $0x1], 1 }

</bundles_post_ra>
